<compile_context>
chip_gen: v7x
topology: tpu7x:2x2x1
jax: 0.10.0
libtpu: 0.0.40
codegen_flags: <defaults>
</compile_context>

<pallas_src>
import functools

import jax
import jax.numpy as jnp
from jax import lax
from jax.experimental import pallas as pl
from jax.experimental.pallas import tpu as pltpu


def _round_up(x, m):
    return ((x + m - 1) // m) * m


def _chip_defaults():
    """Chip-aware (tm, tn, vmem_limit_bytes) based on physical VMEM."""
    vmem_cap = 64 * 1024 * 1024
    try:
        info = pltpu.get_tpu_info()
        vmem_cap = int(getattr(info, "vmem_capacity_bytes", vmem_cap))
    except Exception:
        pass
    if vmem_cap >= 100 * 1024 * 1024:
        # v5e / v6e: 128 MiB VMEM -> large row tiles, 100 MiB scoped limit.
        return 512, 512, 100 * 1024 * 1024
    # v7x: 64 MiB VMEM per TensorCore -> smaller weight tiles, headroom.
    return 384, 256, 52 * 1024 * 1024


def _ffn_body(x_ref, w13_ref, w2_ref, *, tn, precision):
    """Shared math: fused up-proj -> SwiGLU gate -> down-proj partial (f32)."""
    x = x_ref[...].astype(w13_ref.dtype)          # in-kernel cast (VPU, free)
    # Single fused MXU pass for both up-projections of this hidden tile.
    h = jnp.dot(x, w13_ref[...], preferred_element_type=jnp.float32,
                precision=precision)
    h1 = h[:, :tn]
    h3 = h[:, tn:]
    # SwiGLU gate in f32 (VPU + EUP), back to matmul dtype for the down-proj.
    gated = (h1 * jax.nn.sigmoid(h1)) * h3
    return jnp.dot(gated.astype(w2_ref.dtype), w2_ref[...],
                   preferred_element_type=jnp.float32, precision=precision)


def _ffn_kernel_inplace(x_ref, w13_ref, w2_ref, o_ref, *, tn, precision):
    """f32 output: accumulate directly into the resident output block."""
    k = pl.program_id(1)
    partial = _ffn_body(x_ref, w13_ref, w2_ref, tn=tn, precision=precision)

    @pl.when(k == 0)
    def _():
        o_ref[...] = partial

    @pl.when(k > 0)
    def _():
        o_ref[...] += partial


def _ffn_kernel_acc(x_ref, w13_ref, w2_ref, o_ref, acc_ref, *, tn, precision):
    """Non-f32 output: f32 VMEM accumulator, cast once on the last k step."""
    k = pl.program_id(1)
    partial = _ffn_body(x_ref, w13_ref, w2_ref, tn=tn, precision=precision)

    @pl.when(k == 0)
    def _():
        acc_ref[...] = partial

    @pl.when(k > 0)
    def _():
        acc_ref[...] += partial

    @pl.when(k == pl.num_programs(1) - 1)
    def _():
        o_ref[...] = acc_ref[...].astype(o_ref.dtype)


def prepare_ffn_weights(w1, w2, w3, *, tn=None, matmul_dtype=jnp.float32):
    """One-time weight prep (hoist OUTSIDE the hot path).

    w1, w3: (hidden, dim); w2: (dim, hidden)  -- PyTorch nn.Linear layout.
    Returns (w13_fused, w2_t, tn):
      w13_fused: (dim, 2*hidden_pad) per-hidden-tile interleave of w1^T / w3^T
                 so each (dim, 2*tn) block holds [w1 tile | w3 tile],
      w2_t:      (hidden_pad, dim).
    """
    hidden, dim = w1.shape
    if tn is None:
        _, tn, _ = _chip_defaults()
    # Keep tn a multiple of 128 (lane tile / MXU alignment) and no larger than
    # the 128-aligned hidden size.
    tn = max(128, _round_up(tn, 128))
    tn = min(tn, _round_up(hidden, 128))
    hidden_pad = _round_up(hidden, tn)

    w1_t = w1.T.astype(matmul_dtype)   # (dim, hidden)
    w3_t = w3.T.astype(matmul_dtype)   # (dim, hidden)
    w2_t = w2.T.astype(matmul_dtype)   # (hidden, dim)
    if hidden_pad != hidden:
        pad = hidden_pad - hidden
        # Zero-padded hidden columns contribute exactly 0 through the gate.
        w1_t = jnp.pad(w1_t, ((0, 0), (0, pad)))
        w3_t = jnp.pad(w3_t, ((0, 0), (0, pad)))
        w2_t = jnp.pad(w2_t, ((0, pad), (0, 0)))

    nk = hidden_pad // tn
    w13 = jnp.concatenate(
        [w1_t.reshape(dim, nk, tn), w3_t.reshape(dim, nk, tn)], axis=2
    ).reshape(dim, 2 * hidden_pad)
    return w13, w2_t, tn


def feed_forward_prepared(x, w13, w2_t, *, tn, tm=None, vmem_limit_bytes=None):
    """Run the FFN kernel with already-prepared (fused/transposed) weights."""
    orig_shape = x.shape
    orig_dtype = x.dtype
    dim = orig_shape[-1]
    hidden_pad = w2_t.shape[0]
    assert w13.shape == (dim, 2 * hidden_pad)

    default_tm, _, default_vmem = _chip_defaults()
    tm = default_tm if tm is None else tm
    vmem_limit_bytes = default_vmem if vmem_limit_bytes is None else vmem_limit_bytes

    matmul_dtype = w13.dtype
    # NOTE: x stays in its original dtype here; the cast to matmul_dtype
    # happens inside the kernel (no extra HBM pass over the activations).
    x2d = x.reshape(-1, dim)
    M = x2d.shape[0]

    # tm multiple of 16 satisfies both f32 (8) and bf16 (16) sublane packing.
    tm = min(tm, _round_up(M, 16))
    M_pad = _round_up(M, tm)
    if M_pad != M:
        x2d = jnp.pad(x2d, ((0, M_pad - M), (0, 0)))

    grid = (M_pad // tm, hidden_pad // tn)

    # True-f32 MXU passes when asked for an f32 matmul path; bf16 uses default.
    precision = (lax.Precision.HIGHEST
                 if jnp.dtype(matmul_dtype) == jnp.dtype(jnp.float32)
                 else lax.Precision.DEFAULT)

    if jnp.dtype(orig_dtype) == jnp.dtype(jnp.float32):
        kernel = functools.partial(_ffn_kernel_inplace, tn=tn,
                                   precision=precision)
        scratch_shapes = []
    else:
        kernel = functools.partial(_ffn_kernel_acc, tn=tn, precision=precision)
        scratch_shapes = [pltpu.VMEM((tm, dim), jnp.float32)]

    out = pl.pallas_call(
        kernel,
        out_shape=jax.ShapeDtypeStruct((M_pad, dim), orig_dtype),
        grid_spec=pltpu.PrefetchScalarGridSpec(
            num_scalar_prefetch=0,
            grid=grid,
            in_specs=[
                pl.BlockSpec((tm, dim), lambda i, k: (i, 0)),      # x row tile
                pl.BlockSpec((dim, 2 * tn), lambda i, k: (0, k)),  # [w1|w3] tile
                pl.BlockSpec((tn, dim), lambda i, k: (k, 0)),      # w2 tile
            ],
            out_specs=pl.BlockSpec((tm, dim), lambda i, k: (i, 0)),
            scratch_shapes=scratch_shapes,
        ),
        compiler_params=pltpu.CompilerParams(
            # M tiles shard across TCs (megacore); hidden is the reduction.
            dimension_semantics=("parallel", "arbitrary"),
            vmem_limit_bytes=vmem_limit_bytes,
        ),
    )(x2d, w13, w2_t)

    if M_pad != M:
        out = out[:M]
    return out.reshape(orig_shape)


def feed_forward(x, w1, w2, w3, *, tm=None, tn=None, matmul_dtype=None):
    """Convenience wrapper. x: [..., dim]; w1,w3: [hidden, dim]; w2: [dim, hidden].

    For real deployments call prepare_ffn_weights() once and reuse the result,
    and prefer matmul_dtype=jnp.bfloat16 (mandatory for good perf on v5e).
    """
    matmul_dtype = matmul_dtype if matmul_dtype is not None else x.dtype
    w13, w2_t, tn = prepare_ffn_weights(w1, w2, w3, tn=tn,
                                        matmul_dtype=matmul_dtype)
    return feed_forward_prepared(x, w13, w2_t, tn=tn, tm=tm)


def feed_forward_ref(x, w1, w2, w3):
    """Pure-JAX reference matching the PyTorch module exactly."""
    h1 = x @ w1.T
    h3 = x @ w3.T
    silu = h1 * jax.nn.sigmoid(h1)
    return (silu * h3) @ w2.T


if __name__ == "__main__":
    key = jax.random.PRNGKey(0)
    batch, seq, dim, dim_hidden = 2, 8, 32, 64

    kx, k1, k2, k3 = jax.random.split(key, 4)
    x = jax.random.normal(kx, (batch, seq, dim), dtype=jnp.float32)

    # Deterministic "Kaiming-uniform-ish" init (PyTorch Linear default bound).
    def init_linear(k, out_f, in_f):
        bound = 1.0 / (in_f ** 0.5)
        return jax.random.uniform(k, (out_f, in_f), jnp.float32, -bound, bound)

    w1 = init_linear(k1, dim_hidden, dim)   # nn.Linear(dim, dim_hidden).weight
    w2 = init_linear(k2, dim, dim_hidden)   # nn.Linear(dim_hidden, dim).weight
    w3 = init_linear(k3, dim_hidden, dim)   # nn.Linear(dim, dim_hidden).weight

    ref = feed_forward_ref(x, w1, w2, w3)

    # f32 path (HIGHEST precision matmuls): tight match vs reference.
    out = feed_forward(x, w1, w2, w3)
    jax.block_until_ready(out)
    assert out.shape == ref.shape == (batch, seq, dim)
    assert jnp.allclose(out, ref, atol=1e-5, rtol=1e-5), "f32 mismatch vs reference"

    # bf16-MXU path (f32 gating + accumulation): loose tolerance sanity check.
    out_bf16 = feed_forward(x, w1, w2, w3, matmul_dtype=jnp.bfloat16)
    jax.block_until_ready(out_bf16)
    assert out_bf16.shape == ref.shape
    assert jnp.allclose(out_bf16, ref, atol=1e-1, rtol=1e-1), "bf16 mismatch vs reference"

    print("KERNEL_OK")
</pallas_src>

<mosaic_0001>
module attributes {stable_mosaic.version = 11 : i64} {
  func.func @_ffn_kernel_inplace(%arg0: i32, %arg1: i32, %arg2: memref<16x32xf32, #tpu.memory_space<vmem>>, %arg3: memref<32x256xf32, #tpu.memory_space<vmem>>, %arg4: memref<128x32xf32, #tpu.memory_space<vmem>>, %arg5: memref<16x32xf32, #tpu.memory_space<vmem>>) attributes {dimension_semantics = [#tpu.dimension_semantics<parallel>, #tpu.dimension_semantics<arbitrary>], iteration_bounds = array<i64: 1, 1>, scalar_prefetch = 0 : i64, scratch_operands = 0 : i64, tpu.core_type = #tpu.core_type<tc>, window_params = [{transform_indices = @transform_0, window_bounds = array<i64: 16, 32>}, {transform_indices = @transform_1, window_bounds = array<i64: 32, 256>}, {transform_indices = @transform_2, window_bounds = array<i64: 128, 32>}, {transform_indices = @transform_3, window_bounds = array<i64: 16, 32>}]} {
    %c0 = arith.constant 0 : index
    %c0_0 = arith.constant 0 : index
    %0 = vector.load %arg2[%c0, %c0_0] : memref<16x32xf32, #tpu.memory_space<vmem>>, vector<16x32xf32>
    %c0_1 = arith.constant 0 : index
    %c0_2 = arith.constant 0 : index
    %1 = vector.load %arg3[%c0_1, %c0_2] : memref<32x256xf32, #tpu.memory_space<vmem>>, vector<32x256xf32>
    %cst = arith.constant dense<0.000000e+00> : vector<16x256xf32>
    %2 = tpu.matmul %0, %1, %cst {dimension_numbers = #tpu.dot_dimension_numbers<[1], [0], [0], [1], [0, 0, 1, 1], [], []>, precision = #tpu.contract_precision<fp32>} : vector<16x32xf32>, vector<32x256xf32>, vector<16x256xf32> -> vector<16x256xf32>
    %3 = vector.extract_strided_slice %2 {offsets = [0, 0], sizes = [16, 128], strides = [1, 1]} : vector<16x256xf32> to vector<16x128xf32>
    %4 = vector.extract_strided_slice %2 {offsets = [0, 128], sizes = [16, 128], strides = [1, 1]} : vector<16x256xf32> to vector<16x128xf32>
    %5 = arith.negf %3 : vector<16x128xf32>
    %6 = math.exp %5 : vector<16x128xf32>
    %cst_3 = arith.constant 1.000000e+00 : f32
    %7 = vector.broadcast %cst_3 : f32 to vector<16x128xf32>
    %8 = arith.addf %7, %6 : vector<16x128xf32>
    %9 = arith.divf %7, %8 : vector<16x128xf32>
    %10 = arith.mulf %3, %9 : vector<16x128xf32>
    %11 = arith.mulf %10, %4 : vector<16x128xf32>
    %c0_4 = arith.constant 0 : index
    %c0_5 = arith.constant 0 : index
    %12 = vector.load %arg4[%c0_4, %c0_5] : memref<128x32xf32, #tpu.memory_space<vmem>>, vector<128x32xf32>
    %cst_6 = arith.constant dense<0.000000e+00> : vector<16x32xf32>
    %13 = tpu.matmul %11, %12, %cst_6 {dimension_numbers = #tpu.dot_dimension_numbers<[1], [0], [0], [1], [0, 0, 1, 1], [], []>, precision = #tpu.contract_precision<fp32>} : vector<16x128xf32>, vector<128x32xf32>, vector<16x32xf32> -> vector<16x32xf32>
    %c0_i32 = arith.constant 0 : i32
    %14 = arith.cmpi eq, %arg1, %c0_i32 : i32
    %15 = arith.extui %14 : i1 to i32
    %c0_i32_7 = arith.constant 0 : i32
    %16 = arith.cmpi ne, %15, %c0_i32_7 : i32
    scf.if %16 {
      %c0_10 = arith.constant 0 : index
      %c0_11 = arith.constant 0 : index
      %20 = vector.load %arg5[%c0_10, %c0_11] : memref<16x32xf32, #tpu.memory_space<vmem>>, vector<16x32xf32>
      tpu.vector_store %arg5[%c0_10, %c0_11], %13 {strides = array<i32>} : memref<16x32xf32, #tpu.memory_space<vmem>>, vector<16x32xf32>,
    } else {
    }
    %c0_i32_8 = arith.constant 0 : i32
    %17 = arith.cmpi sgt, %arg1, %c0_i32_8 : i32
    %18 = arith.extui %17 : i1 to i32
    %c0_i32_9 = arith.constant 0 : i32
    %19 = arith.cmpi ne, %18, %c0_i32_9 : i32
    scf.if %19 {
      %c0_10 = arith.constant 0 : index
      %c0_11 = arith.constant 0 : index
      %20 = vector.load %arg5[%c0_10, %c0_11] : memref<16x32xf32, #tpu.memory_space<vmem>>, vector<16x32xf32>
      %21 = arith.addf %20, %13 : vector<16x32xf32>
      %c0_12 = arith.constant 0 : index
      %c0_13 = arith.constant 0 : index
      %22 = vector.load %arg5[%c0_12, %c0_13] : memref<16x32xf32, #tpu.memory_space<vmem>>, vector<16x32xf32>
      tpu.vector_store %arg5[%c0_12, %c0_13], %21 {strides = array<i32>} : memref<16x32xf32, #tpu.memory_space<vmem>>, vector<16x32xf32>,
    } else {
    }
    return
  }
  func.func @transform_0(%arg0: i32, %arg1: i32) -> (i32, i32) {
    %c0_i32 = arith.constant 0 : i32
    %c0_i32_0 = arith.constant 0 : i32
    return %arg0, %c0_i32 : i32, i32
  }
  func.func @transform_1(%arg0: i32, %arg1: i32) -> (i32, i32) {
    %c0_i32 = arith.constant 0 : i32
    %c0_i32_0 = arith.constant 0 : i32
    return %c0_i32, %arg1 : i32, i32
  }
  func.func @transform_2(%arg0: i32, %arg1: i32) -> (i32, i32) {
    %c0_i32 = arith.constant 0 : i32
    %c0_i32_0 = arith.constant 0 : i32
    return %arg1, %c0_i32 : i32, i32
  }
  func.func @transform_3(%arg0: i32, %arg1: i32) -> (i32, i32) {
    %c0_i32 = arith.constant 0 : i32
    %c0_i32_0 = arith.constant 0 : i32
    return %arg0, %c0_i32 : i32, i32
  }
}

</mosaic_0001>

<bundles_post_ra>
// kernel: tpu_custom_call.1
= control target key start
LH: loop header
LB: loop body
LE: loop exit
PB: predicated region body
PF: predicated region fallthrough
CT: control target
= control target key end

     0   :  { %vm25_vm0 = vcmask 261120   ;;  %v1998_v9 = vmov 0.0   ;;  %s2441_s0 = inlined_call_operand.vmem [shape: f32[16,32], index: 0, kind: input, shape index: {}]   ;;  %s2442_s1 = inlined_call_operand.vmem [shape: f32[32,256], index: 1, kind: input, shape index: {}]   ;;  %s2443_s2 = inlined_call_operand.vmem [shape: f32[128,32], index: 2, kind: input, shape index: {}]   ;;  %s2444_s3 = inlined_call_operand.hbm [shape: f32[16,32], index: 3, kind: output, shape index: {}]  }
   0x1   :  { %v18_v0 = vld [vmem:[%s2442_s1 + $0x8] sm:$0xff]  ;;  %v20_v1 = vld [vmem:[%s2442_s1 + $0x18] sm:$0xff]  ;;  %v17_v2 = vld [vmem:[%s2442_s1] sm:$0xff]  ;;  %104 = vmatprep.mubr.f32.mxu0 %v1998_v9 }
   0x2   :  { %v32_v3 = vand.u32 4294901760, %v18_v0  ;;  %v36_v4 = vand.u32 4294901760, %v20_v1  ;;  %v19_v5 = vld [vmem:[%s2442_s1 + $0x10] sm:$0xff]  ;;  %v34_v6 = vand.u32 4294901760, %v17_v2  ;;  %v22_v7 = vld [vmem:[%s2442_s1 + $0x28] sm:$0xff]  ;;  %v24_v8 = vld [vmem:[%s2442_s1 + $0x38] sm:$0xff] }
   0x3   :  { %v38_v10 = vand.u32 4294901760, %v19_v5  ;;  %v40_v11 = vand.u32 4294901760, %v22_v7  ;;  %v44_v12 = vand.u32 4294901760, %v24_v8  ;;  %v21_v13 = vld [vmem:[%s2442_s1 + $0x20] sm:$0xff]  ;;  %v23_v14 = vld [vmem:[%s2442_s1 + $0x30] sm:$0xff] }
   0x4   :  { %v15_v15 = vld [vmem:[%s2441_s0] sm:$0xff]  ;;  %v2050_v16 = vpack.c.bf16 %v36_v4, %v32_v3  ;;  %v2052_v17 = vsub.f32 %v18_v0, %v32_v3  ;;  %v2054_v18 = vsub.f32 %v20_v1, %v36_v4  ;;  %v2056_v19 = vsub.f32 %v17_v2, %v34_v6 }
   0x5   :  { %8 = vsyncpa [#allocation3], 0  ;;  %v2058_v20 = vpack.c.bf16 %v38_v10, %v34_v6  ;;  %v2060_v21 = vsub.f32 %v19_v5, %v38_v10  ;;  %v2062_v22 = vpack.c.bf16 %v44_v12, %v40_v11  ;;  %v2064_v23 = vsub.f32 %v22_v7, %v40_v11  ;;  %v16_v32 = vld [vmem:[%s2441_s0 + $0x8] sm:$0xff] }
   0x6   :  { %1693 = vmatprep.subr.bf16.mxu0 %v2050_v16  ;;  %v2067_v24 = vsub.f32 %v24_v8, %v44_v12  ;;  %v42_v25 = vand.u32 4294901760, %v21_v13  ;;  %v46_v26 = vand.u32 4294901760, %v23_v14  ;;  %v27_v27 = vsel %vm25_vm0, %v15_v15, 0 }
   0x7   :  { %1695 = vmatpush1.bf16.msra.mxu0 %v2058_v20  ;;  %v2071_v28 = vand.u32 4294901760, %v27_v27  ;;  %v129_v29 = vand.u32 4294901760, %v2052_v17  ;;  %v141_v30 = vand.u32 4294901760, %v2054_v18  ;;  %v135_v31 = vand.u32 4294901760, %v2056_v19 }
   0x8   :  { %1697 = vmatprep.subr.bf16.mxu0 %v2062_v22  ;;  %v2080_v33 = vpack.c.bf16 %v46_v26, %v42_v25  ;;  %v2082_v34 = vsub.f32 %v21_v13, %v42_v25  ;;  %v2084_v35 = vsub.f32 %v23_v14, %v46_v26  ;;  %v147_v36 = vand.u32 4294901760, %v2060_v21 }
   0x9   :  { %v2088_v37 = vsub.f32 %v27_v27, %v2071_v28  ;;  %v130_v38 = vsub.f32 %v2052_v17, %v129_v29  ;;  %v142_v39 = vsub.f32 %v2054_v18, %v141_v30  ;;  %v136_v40 = vsub.f32 %v2056_v19, %v135_v31 }
   0xa   :  { %v148_v41 = vsub.f32 %v2060_v21, %v147_v36  ;;  %v30_v42 = vsel %vm25_vm0, %v16_v32, 0  ;;  %v153_v43 = vand.u32 4294901760, %v2064_v23  ;;  %v165_v44 = vand.u32 4294901760, %v2067_v24 }
   0xb   :  { %1699 = vmatpush1.bf16.msra.mxu0 %v2080_v33  ;;  %v107_v45 = vand.u32 4294901760, %v2088_v37  ;;  %v131_v46 = vand.u32 4294901760, %v130_v38  ;;  %v143_v47 = vand.u32 4294901760, %v142_v39  ;;  %v137_v48 = vand.u32 4294901760, %v136_v40 }
   0xc   :  { %v149_v49 = vand.u32 4294901760, %v148_v41  ;;  %v2107_v50 = vand.u32 4294901760, %v30_v42  ;;  %v154_v51 = vsub.f32 %v2064_v23, %v153_v43  ;;  %v166_v52 = vsub.f32 %v2067_v24, %v165_v44 }
   0xd   :  { %v108_v53 = vsub.f32 %v2088_v37, %v107_v45  ;;  %v1700_v54 = vpack.c.bf16 %v143_v47, %v131_v46  ;;  %v159_v55 = vand.u32 4294901760, %v2082_v34  ;;  %v171_v56 = vand.u32 4294901760, %v2084_v35 }
   0xe   :  { %v1702_v57 = vpack.c.bf16 %v149_v49, %v137_v48  ;;  %v117_v58 = vsub.f32 %v30_v42, %v2107_v50  ;;  %v155_v59 = vand.u32 4294901760, %v154_v51  ;;  %v167_v60 = vand.u32 4294901760, %v166_v52  ;;  %v650_v52 = vld [vmem:[%s2443_s2 + $0x50] sm:$0xff] }
   0xf   :  { %v109_v61 = vand.u32 4294901760, %v108_v53  ;;  %1701 = vmatprep.subr.bf16.mxu0 %v1700_v54  ;;  %v160_v62 = vsub.f32 %v2082_v34, %v159_v55  ;;  %v172_v63 = vsub.f32 %v2084_v35, %v171_v56  ;;  %v1708_v7 = vpack.c.bf16 %v2054_v18, %v2052_v17  ;;  %v641_v17 = vld [vmem:[%s2443_s2 + $0x8] sm:$0xff]  ;;  %v651_v53 = vld [vmem:[%s2443_s2 + $0x58] sm:$0xff] }
  0x10   :  { %v118_v0 = vand.u32 4294901760, %v117_v58  ;;  %v1704_v1 = vpack.c.bf16 %v167_v60, %v155_v59  ;;  %v1710_v8 = vpack.c.bf16 %v2060_v21, %v2056_v19  ;;  %v1712_v10 = vpack.c.bf16 %v2067_v24, %v2064_v23  ;;  %v652_v60 = vld [vmem:[%s2443_s2 + $0x60] sm:$0xff] }
  0x11   :  { %110 = vmatmul.mubr.f32.vlgmr.msra.gmra.mrb[0].mxu0 %v109_v61  ;;  %v161_v2 = vand.u32 4294901760, %v160_v62  ;;  %v173_v3 = vand.u32 4294901760, %v172_v63  ;;  %v1714_v11 = vpack.c.bf16 %v2084_v35, %v2082_v34  ;;  %v1724_v12 = vpack.c.bf16 %v141_v30, %v129_v29  ;;  %v645_v29 = vld [vmem:[%s2443_s2 + $0x28] sm:$0xff] }
  0x12   :  { %1703 = vmatpush1.bf16.msra.mxu0 %v1702_v57  ;;  %115 = vmatprep.mubr.f32.mxu0 %v1998_v9  ;;  %v119_v4 = vsub.f32 %v117_v58, %v118_v0  ;;  %v1726_v13 = vpack.c.bf16 %v147_v36, %v135_v31  ;;  %v1728_v14 = vpack.c.bf16 %v165_v44, %v153_v43  ;;  %v660_v19 = vand.u32 4294901760, %v641_v17  ;;  %v646_v36 = vld [vmem:[%s2443_s2 + $0x30] sm:$0xff]  ;;  %v648_v44 = vld [vmem:[%s2443_s2 + $0x40] sm:$0xff]  ;;  %v653_v61 = vld [vmem:[%s2443_s2 + $0x68] sm:$0xff] }
  0x13   :  { %1705 = vmatprep.subr.bf16.mxu0 %v1704_v1  ;;  %v1706_v5 = vpack.c.bf16 %v173_v3, %v161_v2  ;;  %v1730_v15 = vpack.c.bf16 %v171_v56, %v159_v55  ;;  %v672_v32 = vand.u32 4294901760, %v645_v29  ;;  %v675_v39 = vand.u32 4294901760, %v646_v36 }
  0x14   :  { %v120_v6 = vand.u32 4294901760, %v119_v4  ;;  %v2167_v21 = vsub.f32 %v641_v17, %v660_v19  ;;  %v681_v47 = vand.u32 4294901760, %v648_v44  ;;  %v687_v55 = vand.u32 4294901760, %v650_v52  ;;  %v654_v4 = vld [vmem:[%s2443_s2 + $0x70] sm:$0xff] }
  0x15   :  { %v2193_v35 = vsub.f32 %v645_v29, %v672_v32  ;;  %v2207_v42 = vsub.f32 %v646_v36, %v675_v39  ;;  %v690_v56 = vand.u32 4294901760, %v651_v53  ;;  %v693_v63 = vand.u32 4294901760, %v652_v60 }
  0x16   :  { %121 = vmatmul.mubr.f32.gmra.mrb[2].mxu0 %v120_v6 }
  0x17   :  { %1707 = vmatpush1.bf16.msra.mxu0 %v1706_v5  ;;  %231 = vmatprep.mubr.f32.mxu0 %v1998_v9  ;;  %v2241_v59 = vsub.f32 %v651_v53, %v690_v56  ;;  %v2255_v2 = vsub.f32 %v652_v60, %v693_v63  ;;  %v655_v5 = vld [vmem:[%s2443_s2 + $0x78] sm:$0xff] }
  0x18   :  { %1709 = vmatprep.subr.bf16.mxu0 %v1708_v7  ;;  %v699_v7 = vand.u32 4294901760, %v654_v4 }
  0x1a   :  { %233 = vmatmul.mubr.f32.vlgmr.msra.gmra.mrb[0].mxu0 %v2071_v28 }
  0x1b   :  { %1711 = vmatpush1.bf16.msra.mxu0 %v1710_v8  ;;  %238 = vmatprep.mubr.f32.mxu0 %v1998_v9  ;;  %v702_v8 = vand.u32 4294901760, %v655_v5 }
  0x1c   :  { %1713 = vmatprep.subr.bf16.mxu0 %v1712_v10  ;;  %v2269_v10 = vpack.c.bf16 %v690_v56, %v687_v55 }
  0x1d   :  { %v2286_v17 = vpack.c.bf16 %v702_v8, %v699_v7 }
  0x1e   :  { %240 = vmatmul.mubr.f32.gmra.mrb[2].mxu0 %v2107_v50 }
  0x1f   :  { %1715 = vmatpush1.bf16.msra.mxu0 %v1714_v11  ;;  %326 = vmatprep.mubr.f32.mxu0 %v1998_v9  ;;  %v2271_v11 = vsub.f32 %v654_v4, %v699_v7 }
  0x20   :  { %1717 = vmatprep.subr.bf16.mxu0 %v2050_v16 }
  0x22   :  { %329 = vmatmul.mubr.f32.vlgmr.msra.gmra.mrb[0].mxu0 %v2088_v37  ;;  %v647_v37 = vld [vmem:[%s2443_s2 + $0x38] sm:$0xff] }
  0x23   :  { %1719 = vmatpush1.bf16.msra.mxu0 %v2058_v20  ;;  %334 = vmatprep.mubr.f32.mxu0 %v1998_v9  ;;  %v678_v40 = vand.u32 4294901760, %v647_v37 }
  0x24   :  { %1721 = vmatprep.subr.bf16.mxu0 %v2062_v22 }
  0x25   :  { %v2209_v43 = vsub.f32 %v647_v37, %v678_v40  ;;  %v2237_v57 = vpack.c.bf16 %v678_v40, %v675_v39 }
  0x26   :  { %337 = vmatmul.mubr.f32.gmra.mrb[2].mxu0 %v117_v58  ;;  %v2239_v58 = vsub.f32 %v650_v52, %v687_v55 }
  0x27   :  { %1723 = vmatpush1.bf16.msra.mxu0 %v2080_v33  ;;  %415 = vmatprep.mubr.f32.mxu0 %v1998_v9  ;;  %v1816_v46 = vpack.c.bf16 %v2209_v43, %v2207_v42 }
  0x28   :  { %1725 = vmatprep.subr.bf16.mxu0 %v1724_v12  ;;  %v1824_v62 = vpack.c.bf16 %v2241_v59, %v2239_v58  ;;  %v2273_v12 = vsub.f32 %v655_v5, %v702_v8  ;;  %v830_v56 = vand.u32 4294901760, %v2239_v58  ;;  %v858_v8 = vand.u32 4294901760, %v2271_v11 }
  0x2a   :  { %419 = vmatmul.mubr.f32.vlgmr.msra.gmra.mrb[0].mxu0 %v107_v45  ;;  %v649_v45 = vld [vmem:[%s2443_s2 + $0x48] sm:$0xff] }
  0x2b   :  { %1727 = vmatpush1.bf16.msra.mxu0 %v1726_v13  ;;  %424 = vmatprep.mubr.f32.mxu0 %v1998_v9  ;;  %v684_v48 = vand.u32 4294901760, %v649_v45  ;;  %v1832_v13 = vpack.c.bf16 %v2273_v12, %v2271_v11 }
  0x2c   :  { %1729 = vmatprep.subr.bf16.mxu0 %v1728_v14 }
  0x2d   :  { %v2225_v51 = vsub.f32 %v649_v45, %v684_v48  ;;  %v2253_v1 = vpack.c.bf16 %v684_v48, %v681_v47 }
  0x2e   :  { %428 = vmatmul.mubr.f32.gmra.mrb[2].mxu0 %v118_v0  ;;  %v696_v0 = vand.u32 4294901760, %v653_v61 }
  0x2f   :  { %1731 = vmatpush1.bf16.msra.mxu0 %v1730_v15  ;;  %522 = vmatprep.mubr.f32.mxu0 %v1998_v9 }
  0x30   :  { %1733 = vmatprep.subr.bf16.mxu0 %v2050_v16  ;;  %v640_v16 = vld [vmem:[%s2443_s2] sm:$0xff]  ;;  %v2257_v3 = vsub.f32 %v653_v61, %v696_v0  ;;  %v2279_v14 = vpack.c.bf16 %v696_v0, %v693_v63  ;;  %v844_v0 = vand.u32 4294901760, %v2255_v2 }
  0x31   :  { %v657_v18 = vand.u32 4294901760, %v640_v16 }
  0x32   :  { %524 = vmatmul.mubr.f32.vlgmr.msra.gmra.mrb[0].mxu0 %v2071_v28  ;;  %v1828_v6 = vpack.c.bf16 %v2257_v3, %v2255_v2 }
  0x33   :  { %1735 = vmatpush1.bf16.msra.mxu0 %v2058_v20  ;;  %529 = vmatprep.mubr.f32.mxu0 %v1998_v9  ;;  %v2165_v20 = vsub.f32 %v640_v16, %v657_v18  ;;  %v767_v16 = vand.u32 4294901760, %v2167_v21 }
  0x34   :  { %1737 = vmatprep.subr.bf16.mxu0 %v2062_v22  ;;  %v643_v22 = vld [vmem:[%s2443_s2 + $0x18] sm:$0xff] }
  0x35   :  { %v1804_v23 = vpack.c.bf16 %v2167_v21, %v2165_v20  ;;  %v666_v25 = vand.u32 4294901760, %v643_v22  ;;  %v760_v15 = vand.u32 4294901760, %v2165_v20 }
  0x36   :  { %531 = vmatmul.mubr.f32.gmra.mrb[2].mxu0 %v2107_v50 }
  0x37   :  { %1739 = vmatpush1.bf16.msra.mxu0 %v2080_v33  ;;  %609 = vmatprep.mubr.f32.mxu0 %v1998_v9  ;;  %v2179_v27 = vsub.f32 %v643_v22, %v666_v25  ;;  %v2189_v33 = vpack.c.bf16 %v660_v19, %v657_v18  ;;  %v761_v18 = vsub.f32 %v2165_v20, %v760_v15 }
  0x38   :  { %1805 = vmatprep.subr.bf16.mxu1 %v1804_v23  ;;  %v768_v19 = vsub.f32 %v2167_v21, %v767_v16 }
  0x39   :  { %1807 = vmatpush3.bf16.msra.mxu1 %v1804_v23  ;;  %1741 = vmatprep.subr.bf16.mxu0 %v2189_v33 }
  0x3a   :  { %611 = vmatmul.mubr.f32.vlgmr.msra.gmra.mrb[0].mxu0 %v2071_v28  ;;  %v644_v28 = vld [vmem:[%s2443_s2 + $0x20] sm:$0xff]  ;;  %v769_v22 = vand.u32 4294901760, %v768_v19  ;;  %v2335_v19 = vpack.c.bf16 %v767_v16, %v760_v15 }
  0x3b   :  { %616 = vmatprep.mubr.f32.mxu0 %v1998_v9  ;;  %v642_v9 = vld [vmem:[%s2443_s2 + $0x10] sm:$0xff]  ;;  %v669_v31 = vand.u32 4294901760, %v644_v28  ;;  %1743 = vmatpush3.bf16.msra.mxu0 %v2189_v33  ;;  %s1999_s2 = smov [#allocation2]  }
  0x3c   :  { %v663_v24 = vand.u32 4294901760, %v642_v9  ;;  %s1361_s6 = sshll.u32 %s1999_s2, 4  ;;  %s1362_s6 = int_to_ptr.vmem [resolvable:$true] %s1361_s6 }
  0x3d   :  { %v2191_v34 = vsub.f32 %v644_v28, %v669_v31  ;;  %v2221_v49 = vpack.c.bf16 %v672_v32, %v669_v31  ;;  %v795_v31 = vand.u32 4294901760, %v2193_v35  ;;  %s1974_s7 = scalar_lea.vmem %s1362_s6, 256  ;;  %p1979_p1 = scmp.lt.s32.totalorder %s1362_s6, %s1362_s6 }
  0x3e   :  { %618 = vmatmul.mubr.f32.gmra.mrb[2].mxu0 %v2107_v50  ;;  %v2177_v26 = vsub.f32 %v642_v9, %v663_v24  ;;  %v2205_v41 = vpack.c.bf16 %v666_v25, %v663_v24  ;;  %v2223_v50 = vsub.f32 %v648_v44, %v681_v47  ;;  %v762_v9 = vand.u32 4294901760, %v761_v18  ;;  %p1975_p0 = scmp.ne.s32.totalorder %s1362_s6, %s1974_s7  ;;  %p1980_p2 = scmp.lt.s32.totalorder %s1974_s7, %s1974_s7 }
  0x3f   :  { %v1812_v38 = vpack.c.bf16 %v2193_v35, %v2191_v34  ;;  %v781_v24 = vand.u32 4294901760, %v2179_v27  ;;  %v796_v37 = vsub.f32 %v2193_v35, %v795_v31 }
  0x40   :  { %v1808_v30 = vpack.c.bf16 %v2179_v27, %v2177_v26  ;;  %1745 = vmatprep.subr.bf16.mxu0 %v2205_v41  ;;  %v1820_v54 = vpack.c.bf16 %v2225_v51, %v2223_v50  ;;  %v774_v23 = vand.u32 4294901760, %v2177_v26  ;;  %v2294_v25 = vpack.c.bf16 %v769_v22, %v762_v9  ;;  %p1981_p3 = por %p1980_p2, %p1979_p1 }
  0x41   :  { %1747 = vmatpush3.bf16.msra.mxu0 %v2205_v41  ;;  %v782_v29 = vsub.f32 %v2179_v27, %v781_v24  ;;  %v797_v39 = vand.u32 4294901760, %v796_v37  ;;  %v809_v27 = vand.u32 4294901760, %v2209_v43  ;;  %v816_v48 = vand.u32 4294901760, %v2223_v50 }
  0x42   :  { %1809 = vmatprep.subr.bf16.mxu1 %v1808_v30  ;;  %1749 = vmatprep.subr.bf16.mxu0 %v2221_v49  ;;  %v775_v28 = vsub.f32 %v2177_v26, %v774_v23  ;;  %v802_v26 = vand.u32 4294901760, %v2207_v42  ;;  %p1982_p4 = pnand %p1981_p3, %p1975_p0 }
  0x43   :  { %1811 = vmatpush3.bf16.msra.mxu1 %v1808_v30  ;;  %v783_v21 = vand.u32 4294901760, %v782_v29  ;;  %v788_v30 = vand.u32 4294901760, %v2191_v34  ;;  %v810_v45 = vsub.f32 %v2209_v43, %v809_v27  ;;  %v817_v35 = vsub.f32 %v2223_v50, %v816_v48 }
  0x44   :  { %1813 = vmatprep.subr.bf16.mxu1 %v1812_v38  ;;  %v776_v20 = vand.u32 4294901760, %v775_v28  ;;  %v803_v44 = vsub.f32 %v2207_v42, %v802_v26  ;;  %v837_v42 = vand.u32 4294901760, %v2241_v59  ;;  %v831_v43 = vsub.f32 %v2239_v58, %v830_v56 }
  0x45   :  { %1751 = vmatpush3.bf16.msra.mxu0 %v2221_v49  ;;  %v789_v36 = vsub.f32 %v2191_v34, %v788_v30  ;;  %v811_v47 = vand.u32 4294901760, %v810_v45  ;;  %v823_v34 = vand.u32 4294901760, %v2225_v51  ;;  %v851_v50 = vand.u32 4294901760, %v2257_v3 }
  0x46   :  { %1753 = vmatprep.subr.bf16.mxu0 %v2237_v57  ;;  %v2301_v32 = vpack.c.bf16 %v783_v21, %v776_v20  ;;  %v838_v61 = vsub.f32 %v2241_v59, %v837_v42  ;;  %v865_v58 = vand.u32 4294901760, %v2273_v12  ;;  %v859_v59 = vsub.f32 %v2271_v11, %v858_v8 }
  0x47   :  { %1815 = vmatpush3.bf16.msra.mxu1 %v1812_v38  ;;  %v790_v38 = vand.u32 4294901760, %v789_v36  ;;  %v824_v53 = vsub.f32 %v2225_v51, %v823_v34  ;;  %v845_v51 = vsub.f32 %v2255_v2, %v844_v0  ;;  %v852_v5 = vsub.f32 %v2257_v3, %v851_v50 }
  0x48   :  { %1817 = vmatprep.subr.bf16.mxu1 %v1816_v46  ;;  %v839_v63 = vand.u32 4294901760, %v838_v61  ;;  %v866_v18 = vsub.f32 %v2273_v12, %v865_v58  ;;  %v860_v9 = vand.u32 4294901760, %v859_v59  ;;  %v2339_v2 = vpack.c.bf16 %v781_v24, %v774_v23 }
  0x49   :  { %1755 = vmatpush3.bf16.msra.mxu0 %v2237_v57  ;;  %v2307_v40 = vpack.c.bf16 %v797_v39, %v790_v38  ;;  %v825_v55 = vand.u32 4294901760, %v824_v53  ;;  %v853_v7 = vand.u32 4294901760, %v852_v5  ;;  %v2341_v3 = vpack.c.bf16 %v795_v31, %v788_v30 }
  0x4a   :  { %1757 = vmatprep.subr.bf16.mxu0 %v2253_v1  ;;  %v867_v22 = vand.u32 4294901760, %v866_v18  ;;  %v2343_v29 = vpack.c.bf16 %v809_v27, %v802_v26  ;;  %v2345_v20 = vpack.c.bf16 %v823_v34, %v816_v48  ;;  %v2347_v21 = vpack.c.bf16 %v837_v42, %v830_v56 }
  0x4b   :  { %1819 = vmatpush3.bf16.msra.mxu1 %v1816_v46  ;;  %v804_v46 = vand.u32 4294901760, %v803_v44  ;;  %v2349_v36 = vpack.c.bf16 %v851_v50, %v844_v0  ;;  %v2351_v11 = vpack.c.bf16 %v865_v58, %v858_v8 }
  0x4c   :  { %1821 = vmatprep.subr.bf16.mxu1 %v1820_v54  ;;  %v2337_v28 = vpack.c.bf16 %v867_v22, %v860_v9 }
  0x4d   :  { %1759 = vmatpush3.bf16.msra.mxu0 %v2253_v1  ;;  %v2313_v52 = vpack.c.bf16 %v811_v47, %v804_v46 }
  0x4e   :  { %1761 = vmatprep.subr.bf16.mxu0 %v2269_v10 }
  0x4f   :  { %1823 = vmatpush3.bf16.msra.mxu1 %v1820_v54  ;;  %v818_v54 = vand.u32 4294901760, %v817_v35 }
  0x50   :  { %1825 = vmatprep.subr.bf16.mxu1 %v1824_v62 }
  0x51   :  { %1763 = vmatpush3.bf16.msra.mxu0 %v2269_v10  ;;  %v2319_v60 = vpack.c.bf16 %v825_v55, %v818_v54 }
  0x52   :  { %1765 = vmatprep.subr.bf16.mxu0 %v2279_v14 }
  0x53   :  { %1827 = vmatpush3.bf16.msra.mxu1 %v1824_v62  ;;  %v832_v62 = vand.u32 4294901760, %v831_v43 }
  0x54   :  { %1829 = vmatprep.subr.bf16.mxu1 %v1828_v6 }
  0x55   :  { %1767 = vmatpush3.bf16.msra.mxu0 %v2279_v14  ;;  %v2325_v4 = vpack.c.bf16 %v839_v63, %v832_v62 }
  0x56   :  { %1769 = vmatprep.subr.bf16.mxu0 %v2286_v17 }
  0x57   :  { %1831 = vmatpush3.bf16.msra.mxu1 %v1828_v6  ;;  %v846_v6 = vand.u32 4294901760, %v845_v51 }
  0x58   :  { %1833 = vmatprep.subr.bf16.mxu1 %v1832_v13 }
  0x59   :  { %1771 = vmatpush3.bf16.msra.mxu0 %v2286_v17 }
  0x5a   :  { %1773 = vmatprep.subr.bf16.mxu0 %v2294_v25 }
  0x5b   :  { %1835 = vmatpush3.bf16.msra.mxu1 %v1832_v13  ;;  %v2331_v13 = vpack.c.bf16 %v853_v7, %v846_v6 }
  0x5c   :  { %1837 = vmatprep.subr.bf16.mxu1 %v2189_v33 }
 0x10d   :  { %v612_v12 = vpop.f32.mrb[0].mxu0 }
 0x10e   :  { %v1372_v15 = vmul.f32 -1.442695, %v612_v12  ;;  %v614_v16 = vpop.f32.mrb[1].mxu0 }
 0x110   :  { %1966 = vpow2.f32 %v1372_v15 }
 0x111   :  { %v619_v37 = vpop.f32.mrb[2].mxu0 }
 0x112   :  { %v1373_v38 = vmul.f32 -1.442695, %v619_v37  ;;  %v621_v23 = vpop.f32.mrb[3].mxu0 }
 0x114   :  { %1968 = vpow2.f32 %v1373_v38 }
 0x11a   :  { %v1967_v24 = vpop.eup %1966 }
 0x11b   :  { %v630_v30 = vadd.f32 1.0, %v1967_v24 }
 0x11d   :  { %1970 = vrcp.f32 %v630_v30 }
 0x11e   :  { %v1969_v31 = vpop.eup %1968 }
 0x11f   :  { %v631_v39 = vadd.f32 1.0, %v1969_v31 }
 0x121   :  { %1972 = vrcp.f32 %v631_v39 }
 0x127   :  { %v1971_v26 = vpop.eup %1970 }
 0x128   :  { %v636_v27 = vmul.f32 %v1971_v26, %v612_v12 }
 0x12a   :  { %v638_v44 = vmul.f32 %v636_v27, %v614_v16 }
 0x12b   :  { %v1973_v45 = vpop.eup %1972 }
 0x12c   :  { %v2353_v46 = vand.u32 4294901760, %v638_v44  ;;  %v637_v47 = vmul.f32 %v1973_v45, %v619_v37 }
 0x12e   :  { %v738_v48 = vsub.f32 %v638_v44, %v2353_v46  ;;  %v639_v34 = vmul.f32 %v637_v47, %v621_v23 }
 0x130   :  { %v2356_v35 = vand.u32 4294901760, %v639_v34  ;;  %1584 = vmatprep.mubr.f32.mxu1 %v738_v48  ;;  %v739_v53 = vand.u32 4294901760, %v738_v48 }
 0x132   :  { %v748_v54 = vsub.f32 %v639_v34, %v2356_v35  ;;  %v740_v55 = vsub.f32 %v738_v48, %v739_v53 }
 0x134   :  { %v749_v56 = vand.u32 4294901760, %v748_v54  ;;  %1585 = vmatmul.mubr.f32.vlgmr.msra.gmra.mrb[0].mxu1 %v748_v54  ;;  %v741_v42 = vand.u32 4294901760, %v740_v55 }
 0x135   :  { %1839 = vmatpush3.bf16.msra.mxu1 %v2189_v33  ;;  %1619 = vmatprep.mubr.f32.mxu1 %v739_v53 }
 0x136   :  { %v750_v43 = vsub.f32 %v748_v54, %v749_v56  ;;  %1514 = vmatprep.mubr.f32.mxu0 %v741_v42  ;;  %1841 = vmatprep.subr.bf16.mxu1 %v2205_v41 }
 0x138   :  { %v751_v61 = vand.u32 4294901760, %v750_v43 }
 0x139   :  { %1843 = vmatpush3.bf16.msra.mxu1 %v2205_v41 }
 0x13a   :  { %1515 = vmatmul.mubr.f32.vlgmr.msra.gmra.mrb[4].mxu0 %v751_v61  ;;  %1845 = vmatprep.subr.bf16.mxu1 %v2221_v49 }
 0x13b   :  { %1775 = vmatpush3.bf16.msra.mxu0 %v2294_v25  ;;  %1549 = vmatprep.mubr.f32.mxu0 %v2353_v46 }
 0x13c   :  { %1777 = vmatprep.subr.bf16.mxu0 %v2301_v32 }
 0x13d   :  { %1847 = vmatpush3.bf16.msra.mxu1 %v2221_v49 }
 0x13e   :  { %1849 = vmatprep.subr.bf16.mxu1 %v2237_v57 }
 0x13f   :  { %1779 = vmatpush3.bf16.msra.mxu0 %v2301_v32 }
 0x140   :  { %1781 = vmatprep.subr.bf16.mxu0 %v2307_v40 }
 0x141   :  { %1851 = vmatpush3.bf16.msra.mxu1 %v2237_v57 }
 0x142   :  { %1853 = vmatprep.subr.bf16.mxu1 %v2253_v1 }
 0x143   :  { %1783 = vmatpush3.bf16.msra.mxu0 %v2307_v40 }
 0x144   :  { %1785 = vmatprep.subr.bf16.mxu0 %v2313_v52 }
 0x145   :  { %1855 = vmatpush3.bf16.msra.mxu1 %v2253_v1 }
 0x146   :  { %1857 = vmatprep.subr.bf16.mxu1 %v2269_v10 }
 0x147   :  { %1787 = vmatpush3.bf16.msra.mxu0 %v2313_v52 }
 0x148   :  { %1789 = vmatprep.subr.bf16.mxu0 %v2319_v60 }
 0x149   :  { %1859 = vmatpush3.bf16.msra.mxu1 %v2269_v10 }
 0x14a   :  { %1861 = vmatprep.subr.bf16.mxu1 %v2279_v14 }
 0x14b   :  { %1791 = vmatpush3.bf16.msra.mxu0 %v2319_v60 }
 0x14c   :  { %1793 = vmatprep.subr.bf16.mxu0 %v2325_v4 }
 0x14d   :  { %1863 = vmatpush3.bf16.msra.mxu1 %v2279_v14 }
 0x14e   :  { %1865 = vmatprep.subr.bf16.mxu1 %v2286_v17 }
 0x14f   :  { %1795 = vmatpush3.bf16.msra.mxu0 %v2325_v4 }
 0x150   :  { %1797 = vmatprep.subr.bf16.mxu0 %v2331_v13 }
 0x151   :  { %1867 = vmatpush3.bf16.msra.mxu1 %v2286_v17 }
 0x152   :  { %1869 = vmatprep.subr.bf16.mxu1 %v2335_v19 }
 0x153   :  { %1799 = vmatpush3.bf16.msra.mxu0 %v2331_v13 }
 0x154   :  { %1620 = vmatmul.mubr.f32.vlgmr.msra.gmra.mrb[0].mxu1 %v749_v56  ;;  %1801 = vmatprep.subr.bf16.mxu0 %v2337_v28 }
 0x155   :  { %1871 = vmatpush3.bf16.msra.mxu1 %v2335_v19  ;;  %1654 = vmatprep.mubr.f32.mxu1 %v2353_v46 }
 0x156   :  { %1873 = vmatprep.subr.bf16.mxu1 %v2339_v2 }
 0x157   :  { %1803 = vmatpush3.bf16.msra.mxu0 %v2337_v28 }
 0x159   :  { %1875 = vmatpush3.bf16.msra.mxu1 %v2339_v2 }
 0x15a   :  { %1550 = vmatmul.mubr.f32.vlgmr.msra.gmra.mrb[4].mxu0 %v2356_v35  ;;  %1877 = vmatprep.subr.bf16.mxu1 %v2341_v3 }
 0x15d   :  { %1879 = vmatpush3.bf16.msra.mxu1 %v2341_v3 }
 0x15e   :  { %1881 = vmatprep.subr.bf16.mxu1 %v2343_v29 }
 0x161   :  { %1883 = vmatpush3.bf16.msra.mxu1 %v2343_v29 }
 0x162   :  { %1885 = vmatprep.subr.bf16.mxu1 %v2345_v20 }
 0x165   :  { %1887 = vmatpush3.bf16.msra.mxu1 %v2345_v20 }
 0x166   :  { %1889 = vmatprep.subr.bf16.mxu1 %v2347_v21 }
 0x169   :  { %1891 = vmatpush3.bf16.msra.mxu1 %v2347_v21 }
 0x16a   :  { %1893 = vmatprep.subr.bf16.mxu1 %v2349_v36 }
 0x16d   :  { %1895 = vmatpush3.bf16.msra.mxu1 %v2349_v36 }
 0x16e   :  { %1897 = vmatprep.subr.bf16.mxu1 %v2351_v11 }
 0x171   :  { %1899 = vmatpush3.bf16.msra.mxu1 %v2351_v11 }
 0x172   :  { %1901 = vmatprep.subr.bf16.mxu1 %v2189_v33 }
 0x174   :  { %1655 = vmatmul.mubr.f32.vlgmr.msra.gmra.mrb[0].mxu1 %v2356_v35 }
 0x175   :  { %1903 = vmatpush3.bf16.msra.mxu1 %v2189_v33  ;;  %1689 = vmatprep.mubr.f32.mxu1 %v2353_v46 }
 0x176   :  { %1905 = vmatprep.subr.bf16.mxu1 %v2205_v41 }
 0x179   :  { %1907 = vmatpush3.bf16.msra.mxu1 %v2205_v41 }
 0x17a   :  { %1909 = vmatprep.subr.bf16.mxu1 %v2221_v49 }
 0x17d   :  { %1911 = vmatpush3.bf16.msra.mxu1 %v2221_v49 }
 0x17e   :  { %1913 = vmatprep.subr.bf16.mxu1 %v2237_v57 }
 0x181   :  { %1915 = vmatpush3.bf16.msra.mxu1 %v2237_v57 }
 0x182   :  { %1917 = vmatprep.subr.bf16.mxu1 %v2253_v1 }
 0x185   :  { %1919 = vmatpush3.bf16.msra.mxu1 %v2253_v1 }
 0x186   :  { %1921 = vmatprep.subr.bf16.mxu1 %v2269_v10 }
 0x189   :  { %1923 = vmatpush3.bf16.msra.mxu1 %v2269_v10 }
 0x18a   :  { %1925 = vmatprep.subr.bf16.mxu1 %v2279_v14 }
 0x18d   :  { %1927 = vmatpush3.bf16.msra.mxu1 %v2279_v14 }
 0x18e   :  { %1929 = vmatprep.subr.bf16.mxu1 %v2286_v17 }
 0x191   :  { %1931 = vmatpush3.bf16.msra.mxu1 %v2286_v17 }
 0x194   :  { %1690 = vmatmul.mubr.f32.vlgmr.msra.gmra.mrb[0].mxu1 %v2356_v35 }
 0x22d   :  { %v1551_v33 = vpop.f32.mrb[4].mxu0 }
 0x22e   :  { %v904_v41 = vpop.f32.mrb[5].mxu0 }
 0x267   :  { %v1691_v49 = vpop.f32.mrb[0].mxu1 }
 0x268   :  { %v1932_v57 = vadd.f32 %v1691_v49, %v1551_v33  ;;  %v1330_v1 = vpop.f32.mrb[1].mxu1 }
 0x269   :  { %v1933_v25 = vadd.f32 %v1330_v1, %v904_v41 }
 0x26a   :  { %1345 = vst.msk [vmem:[#allocation2 + $0x8] sm:$0xff] %vm25_vm0, %v1932_v57 }
 0x26b   :  { %1344 = vst.msk [vmem:[#allocation2] sm:$0xff] %vm25_vm0, %v1933_v25 }
 0x26c   :  { %1985 = shalt.err (!%p1982_p4)
}
 0x26d   :  { %s1986_s10 = scalar_lea.hbm %s2444_s3, 256 }
 0x26e   :  { %p1987_p5 = scmp.ne.s32.totalorder %s2444_s3, %s1986_s10  ;;  %p1990_p6 = scmp.lt.u32.totalorder %s1986_s10, %s2444_s3 }
 0x270   :  { %p1992_p7 = pnand %p1990_p6, %p1987_p5 }
 0x272   :  { %1995 = shalt.err (!%p1992_p7)
}
 0x273   :  { %s2000_s15 = smov 128   ;;  %s2001_s16 = smov 8  }
 0x274   :  { %1367 = dma.vmem_to_hbm [thread:$0]  %s1362_s6, 256, %s2444_s3, [#allocation3], %s2000_s15, %s2000_s15, %s2001_s16  }
 0x275   :  { %1996 = dma.done.wait [#allocation3], 256  }
 0x276   :  { %1997 = vsyncadd [#allocation3], 4294967040 }
 0x277   :  { %1371 = vsyncpa [#allocation3], 1 }

</bundles_post_ra>
